<compile_context>
chip_gen: v6e
topology: v6e:2x2x1
jax: 0.10.0
libtpu: 0.0.40
codegen_flags: <defaults>
</compile_context>

<pallas_src>
import functools

import jax
import jax.numpy as jnp
from jax.experimental import pallas as pl
from jax.experimental.pallas import tpu as pltpu

HIDDEN1 = 256   # fc1 out / attention dim
HIDDEN2 = 128   # fc2 out
LANES = 128     # lane width for padding the logits


def _round_up(n, m):
    return ((n + m - 1) // m) * m


def spectralnet_kernel(
    x_ref,
    w1_ref, b1_ref,
    wvw2_ref, bf_ref,
    w3_ref, b3_ref,
    out_ref,
    *, store_features,
):
    # fc1 + ReLU  (bf16 operands, f32 MXU accumulation, f32 bias/ReLU)
    h1 = jnp.dot(x_ref[...], w1_ref[...], preferred_element_type=jnp.float32)
    h1 = jnp.maximum(h1 + b1_ref[...], 0.0)                          # [TB, 256] f32

    # Attention over a length-1 sequence is the value projection (softmax == 1),
    # and the value projection has been folded into fc2 in the wrapper:
    #   feat = relu(h1 @ (wv @ w2) + (bv @ w2 + b2))
    feat = jnp.dot(h1.astype(wvw2_ref.dtype), wvw2_ref[...],
                   preferred_element_type=jnp.float32)
    feat = jnp.maximum(feat + bf_ref[...], 0.0)                       # [TB, 128] f32

    # fc3 -> logits (output lanes zero-padded to 128 for lane-dense stores)
    logits = jnp.dot(feat.astype(w3_ref.dtype), w3_ref[...],
                     preferred_element_type=jnp.float32) + b3_ref[...]  # [TB, 128]

    if store_features:
        out_ref[...] = jnp.concatenate(
            [feat.astype(out_ref.dtype), logits.astype(out_ref.dtype)], axis=-1)
    else:
        out_ref[...] = logits.astype(out_ref.dtype)


@functools.partial(jax.jit, static_argnames=("block_b", "return_features"))
def spectralnet_forward(x, params, *, block_b=2048, return_features=True):
    """Returns (outputs, features) in bf16 (f32 accumulation inside the kernel)."""
    B, d_in = x.shape
    num_classes = params["w3"].shape[1]

    # --- batch tiling -------------------------------------------------------
    # Round to 16 rows (bf16 sublane packing).  If a single tile would cover
    # the whole padded batch, split it so the grid has >=2 steps (dual-TC v7x).
    b16 = _round_up(max(B, 1), 16)
    if b16 <= 16:
        tb = 16
    else:
        tb = min(block_b, _round_up(pl.cdiv(b16, 2), 16))
    b_pad = _round_up(B, tb)
    if b_pad != B:
        x = jnp.pad(x, ((0, b_pad - B), (0, 0)))

    # --- weight prep (bf16 weights, f32 biases, wv/bv folded into fc2) ------
    w1 = params["w1"].astype(jnp.bfloat16)
    b1 = params["b1"].astype(jnp.float32)
    wv_w2 = jnp.dot(params["wv"].astype(jnp.float32),
                    params["w2"].astype(jnp.float32)).astype(jnp.bfloat16)
    b_fused = (jnp.dot(params["bv"].astype(jnp.float32),
                       params["w2"].astype(jnp.float32))
               + params["b2"].astype(jnp.float32))
    w3 = params["w3"].astype(jnp.bfloat16)
    b3 = params["b3"].astype(jnp.float32)

    # Zero-pad fc3 to a full 128-lane output (aligned MXU N, unmasked stores).
    n_pad = _round_up(max(num_classes, 1), LANES)
    w3 = jnp.pad(w3, ((0, 0), (0, n_pad - num_classes)))
    b3 = jnp.pad(b3, ((0, 0), (0, n_pad - num_classes)))

    x_bf = x.astype(jnp.bfloat16)
    grid = (b_pad // tb,)
    n_out = (HIDDEN2 if return_features else 0) + n_pad

    def batch_spec(cols):
        return pl.BlockSpec((tb, cols), lambda i: (i, 0))

    def resident_spec(shape):  # weights/biases stay resident across grid steps
        return pl.BlockSpec(shape, lambda i: (0, 0))

    args = (x_bf, w1, b1, wv_w2, b_fused, w3, b3)
    in_specs = [batch_spec(d_in)] + [resident_spec(a.shape) for a in args[1:]]

    flops = 2 * b_pad * (d_in * HIDDEN1 + HIDDEN1 * HIDDEN2 + HIDDEN2 * n_pad)
    bytes_accessed = (sum(a.size * a.dtype.itemsize for a in args)
                      + b_pad * n_out * 2)

    fused = pl.pallas_call(
        functools.partial(spectralnet_kernel, store_features=return_features),
        out_shape=jax.ShapeDtypeStruct((b_pad, n_out), jnp.bfloat16),
        grid=grid,
        in_specs=in_specs,
        out_specs=batch_spec(n_out),
        compiler_params=pltpu.CompilerParams(
            dimension_semantics=("parallel",)),
        cost_estimate=pl.CostEstimate(
            flops=flops, transcendentals=0, bytes_accessed=bytes_accessed),
    )(*args)

    if return_features:
        features = fused[:B, :HIDDEN2]
        outputs = fused[:B, HIDDEN2:HIDDEN2 + num_classes]
        return outputs, features
    return fused[:B, :num_classes], None


def init_params(key, input_dim, num_classes):
    """Deterministic synthetic init; weights stored as (in, out), biases (1, out)."""
    keys = jax.random.split(key, 7)

    def linear(k, fan_in, fan_out):
        bound = 1.0 / jnp.sqrt(jnp.float32(fan_in))
        kw, kb = jax.random.split(k)
        w = jax.random.uniform(kw, (fan_in, fan_out), jnp.float32, -bound, bound)
        b = jax.random.uniform(kb, (1, fan_out), jnp.float32, -bound, bound)
        return w, b

    w1, b1 = linear(keys[0], input_dim, HIDDEN1)
    wq, bq = linear(keys[1], HIDDEN1, HIDDEN1)
    wk, bk = linear(keys[2], HIDDEN1, HIDDEN1)
    wv, bv = linear(keys[3], HIDDEN1, HIDDEN1)
    w2, b2 = linear(keys[4], HIDDEN1, HIDDEN2)
    w3, b3 = linear(keys[5], HIDDEN2, num_classes)
    return dict(w1=w1, b1=b1, wq=wq, bq=bq, wk=wk, bk=bk,
                wv=wv, bv=bv, w2=w2, b2=b2, w3=w3, b3=b3)


def reference_forward_f32(x, params):
    """Pure-JAX f32 reference mirroring the PyTorch forward exactly (q/k/softmax)."""
    h1 = jnp.maximum(x @ params["w1"] + params["b1"], 0.0)
    h1s = h1[:, None, :]                                   # unsqueeze(1)
    q = h1s @ params["wq"] + params["bq"]
    k = h1s @ params["wk"] + params["bk"]
    v = h1s @ params["wv"] + params["bv"]
    scores = jnp.matmul(q, jnp.swapaxes(k, -2, -1)) / jnp.sqrt(jnp.float32(HIDDEN1))
    weights = jax.nn.softmax(scores, axis=-1)
    attn = jnp.matmul(weights, v)[:, 0, :]                 # squeeze(1)
    feat = jnp.maximum(attn @ params["w2"] + params["b2"], 0.0)
    out = feat @ params["w3"] + params["b3"]
    return out, feat


def reference_forward_kernel_precision(x, params):
    """Same numerics as the kernel: bf16 matmul operands, f32 accumulation,
    wv/bv folded into fc2 (f32 fold, bf16 fused weight), bf16 output rounding."""
    def mm(a, w):
        return jnp.dot(a.astype(jnp.bfloat16), w.astype(jnp.bfloat16),
                       preferred_element_type=jnp.float32)
    wv_w2 = (params["wv"] @ params["w2"]).astype(jnp.bfloat16)
    b_fused = params["bv"] @ params["w2"] + params["b2"]
    h1 = jnp.maximum(mm(x, params["w1"]) + params["b1"], 0.0)
    feat = jnp.maximum(mm(h1, wv_w2) + b_fused, 0.0)
    out = mm(feat, params["w3"]) + params["b3"]
    return out.astype(jnp.bfloat16), feat.astype(jnp.bfloat16)


if __name__ == "__main__":
    B, INPUT_DIM, NUM_CLASSES = 8, 32, 10

    key = jax.random.PRNGKey(0)
    kx, kp = jax.random.split(key)
    x = jax.random.normal(kx, (B, INPUT_DIM), jnp.float32)
    params = init_params(kp, INPUT_DIM, NUM_CLASSES)

    outputs, features = spectralnet_forward(x, params)
    jax.block_until_ready((outputs, features))

    assert outputs.shape == (B, NUM_CLASSES)
    assert features.shape == (B, HIDDEN2)

    out_f32 = outputs.astype(jnp.float32)
    feat_f32 = features.astype(jnp.float32)

    # Matching-precision reference (same fold / bf16 / f32-accum math as the kernel).
    ref_out, ref_feat = reference_forward_kernel_precision(x, params)
    assert jnp.allclose(out_f32, ref_out.astype(jnp.float32), atol=2e-2, rtol=2e-2)
    assert jnp.allclose(feat_f32, ref_feat.astype(jnp.float32), atol=2e-2, rtol=2e-2)

    # Full-f32 reference mirroring the PyTorch module (loose tol covers bf16).
    f32_out, f32_feat = reference_forward_f32(x, params)
    assert jnp.allclose(out_f32, f32_out, atol=1e-1, rtol=1e-1)
    assert jnp.allclose(feat_f32, f32_feat, atol=1e-1, rtol=1e-1)

    print("KERNEL_OK")
</pallas_src>

<mosaic_0001>
module attributes {stable_mosaic.version = 11 : i64} {
  func.func @spectralnet_kernel(%arg0: i32, %arg1: memref<16x32xbf16, #tpu.memory_space<vmem>>, %arg2: memref<32x256xbf16, #tpu.memory_space<vmem>>, %arg3: memref<1x256xf32, #tpu.memory_space<vmem>>, %arg4: memref<256x128xbf16, #tpu.memory_space<vmem>>, %arg5: memref<1x128xf32, #tpu.memory_space<vmem>>, %arg6: memref<128x128xbf16, #tpu.memory_space<vmem>>, %arg7: memref<1x128xf32, #tpu.memory_space<vmem>>, %arg8: memref<16x256xbf16, #tpu.memory_space<vmem>>) attributes {dimension_semantics = [#tpu.dimension_semantics<parallel>], iteration_bounds = array<i64: 1>, scalar_prefetch = 0 : i64, scratch_operands = 0 : i64, tpu.core_type = #tpu.core_type<tc>, window_params = [{transform_indices = @transform_0, window_bounds = array<i64: 16, 32>}, {pipeline_mode = #tpu.pipeline_mode<synchronous>, transform_indices = @transform_1, window_bounds = array<i64: 32, 256>}, {pipeline_mode = #tpu.pipeline_mode<synchronous>, transform_indices = @transform_2, window_bounds = array<i64: 1, 256>}, {pipeline_mode = #tpu.pipeline_mode<synchronous>, transform_indices = @transform_3, window_bounds = array<i64: 256, 128>}, {pipeline_mode = #tpu.pipeline_mode<synchronous>, transform_indices = @transform_4, window_bounds = array<i64: 1, 128>}, {pipeline_mode = #tpu.pipeline_mode<synchronous>, transform_indices = @transform_5, window_bounds = array<i64: 128, 128>}, {pipeline_mode = #tpu.pipeline_mode<synchronous>, transform_indices = @transform_6, window_bounds = array<i64: 1, 128>}, {transform_indices = @transform_7, window_bounds = array<i64: 16, 256>}]} {
    %c0 = arith.constant 0 : index
    %c0_0 = arith.constant 0 : index
    %0 = vector.load %arg1[%c0, %c0_0] : memref<16x32xbf16, #tpu.memory_space<vmem>>, vector<16x32xbf16>
    %c0_1 = arith.constant 0 : index
    %c0_2 = arith.constant 0 : index
    %1 = vector.load %arg2[%c0_1, %c0_2] : memref<32x256xbf16, #tpu.memory_space<vmem>>, vector<32x256xbf16>
    %cst = arith.constant dense<0.000000e+00> : vector<16x256xf32>
    %2 = tpu.matmul %0, %1, %cst {dimension_numbers = #tpu.dot_dimension_numbers<[1], [0], [0], [1], [0, 0, 1, 1], [], []>} : vector<16x32xbf16>, vector<32x256xbf16>, vector<16x256xf32> -> vector<16x256xf32>
    %c0_3 = arith.constant 0 : index
    %c0_4 = arith.constant 0 : index
    %3 = vector.load %arg3[%c0_3, %c0_4] : memref<1x256xf32, #tpu.memory_space<vmem>>, vector<1x256xf32>
    %4 = vector.broadcast %3 : vector<1x256xf32> to vector<16x256xf32>
    %5 = arith.addf %2, %4 : vector<16x256xf32>
    %cst_5 = arith.constant 0.000000e+00 : f32
    %6 = vector.broadcast %cst_5 : f32 to vector<16x256xf32>
    %7 = arith.maximumf %5, %6 : vector<16x256xf32>
    %8 = arith.truncf %7 : vector<16x256xf32> to vector<16x256xbf16>
    %c0_6 = arith.constant 0 : index
    %c0_7 = arith.constant 0 : index
    %9 = vector.load %arg4[%c0_6, %c0_7] : memref<256x128xbf16, #tpu.memory_space<vmem>>, vector<256x128xbf16>
    %cst_8 = arith.constant dense<0.000000e+00> : vector<16x128xf32>
    %10 = tpu.matmul %8, %9, %cst_8 {dimension_numbers = #tpu.dot_dimension_numbers<[1], [0], [0], [1], [0, 0, 1, 1], [], []>} : vector<16x256xbf16>, vector<256x128xbf16>, vector<16x128xf32> -> vector<16x128xf32>
    %c0_9 = arith.constant 0 : index
    %c0_10 = arith.constant 0 : index
    %11 = vector.load %arg5[%c0_9, %c0_10] : memref<1x128xf32, #tpu.memory_space<vmem>>, vector<1x128xf32>
    %12 = vector.broadcast %11 : vector<1x128xf32> to vector<16x128xf32>
    %13 = arith.addf %10, %12 : vector<16x128xf32>
    %cst_11 = arith.constant 0.000000e+00 : f32
    %14 = vector.broadcast %cst_11 : f32 to vector<16x128xf32>
    %15 = arith.maximumf %13, %14 : vector<16x128xf32>
    %16 = arith.truncf %15 : vector<16x128xf32> to vector<16x128xbf16>
    %c0_12 = arith.constant 0 : index
    %c0_13 = arith.constant 0 : index
    %17 = vector.load %arg6[%c0_12, %c0_13] : memref<128x128xbf16, #tpu.memory_space<vmem>>, vector<128x128xbf16>
    %cst_14 = arith.constant dense<0.000000e+00> : vector<16x128xf32>
    %18 = tpu.matmul %16, %17, %cst_14 {dimension_numbers = #tpu.dot_dimension_numbers<[1], [0], [0], [1], [0, 0, 1, 1], [], []>} : vector<16x128xbf16>, vector<128x128xbf16>, vector<16x128xf32> -> vector<16x128xf32>
    %c0_15 = arith.constant 0 : index
    %c0_16 = arith.constant 0 : index
    %19 = vector.load %arg7[%c0_15, %c0_16] : memref<1x128xf32, #tpu.memory_space<vmem>>, vector<1x128xf32>
    %20 = vector.broadcast %19 : vector<1x128xf32> to vector<16x128xf32>
    %21 = arith.addf %18, %20 : vector<16x128xf32>
    %22 = arith.truncf %15 : vector<16x128xf32> to vector<16x128xbf16>
    %23 = arith.truncf %21 : vector<16x128xf32> to vector<16x128xbf16>
    %24 = tpu.concatenate %22, %23 in 1 : vector<16x128xbf16>, vector<16x128xbf16> -> vector<16x256xbf16>
    %c0_17 = arith.constant 0 : index
    %c0_18 = arith.constant 0 : index
    %25 = vector.load %arg8[%c0_17, %c0_18] : memref<16x256xbf16, #tpu.memory_space<vmem>>, vector<16x256xbf16>
    tpu.vector_store %arg8[%c0_17, %c0_18], %24 {strides = array<i32>} : memref<16x256xbf16, #tpu.memory_space<vmem>>, vector<16x256xbf16>,
    return
  }
  func.func @transform_0(%arg0: i32) -> (i32, i32) {
    %c0_i32 = arith.constant 0 : i32
    %c0_i32_0 = arith.constant 0 : i32
    return %arg0, %c0_i32 : i32, i32
  }
  func.func @transform_1(%arg0: i32) -> (i32, i32) {
    %c0_i32 = arith.constant 0 : i32
    %c0_i32_0 = arith.constant 0 : i32
    %c0_i32_1 = arith.constant 0 : i32
    return %c0_i32, %c0_i32_0 : i32, i32
  }
  func.func @transform_2(%arg0: i32) -> (i32, i32) {
    %c0_i32 = arith.constant 0 : i32
    %c0_i32_0 = arith.constant 0 : i32
    %c0_i32_1 = arith.constant 0 : i32
    return %c0_i32, %c0_i32_0 : i32, i32
  }
  func.func @transform_3(%arg0: i32) -> (i32, i32) {
    %c0_i32 = arith.constant 0 : i32
    %c0_i32_0 = arith.constant 0 : i32
    %c0_i32_1 = arith.constant 0 : i32
    return %c0_i32, %c0_i32_0 : i32, i32
  }
  func.func @transform_4(%arg0: i32) -> (i32, i32) {
    %c0_i32 = arith.constant 0 : i32
    %c0_i32_0 = arith.constant 0 : i32
    %c0_i32_1 = arith.constant 0 : i32
    return %c0_i32, %c0_i32_0 : i32, i32
  }
  func.func @transform_5(%arg0: i32) -> (i32, i32) {
    %c0_i32 = arith.constant 0 : i32
    %c0_i32_0 = arith.constant 0 : i32
    %c0_i32_1 = arith.constant 0 : i32
    return %c0_i32, %c0_i32_0 : i32, i32
  }
  func.func @transform_6(%arg0: i32) -> (i32, i32) {
    %c0_i32 = arith.constant 0 : i32
    %c0_i32_0 = arith.constant 0 : i32
    %c0_i32_1 = arith.constant 0 : i32
    return %c0_i32, %c0_i32_0 : i32, i32
  }
  func.func @transform_7(%arg0: i32) -> (i32, i32) {
    %c0_i32 = arith.constant 0 : i32
    %c0_i32_0 = arith.constant 0 : i32
    return %arg0, %c0_i32 : i32, i32
  }
}

</mosaic_0001>

<bundles_post_ra>
// kernel: spectralnet_forward.1
= control target key start
LH: loop header
LB: loop body
LE: loop exit
PB: predicated region body
PF: predicated region fallthrough
CT: control target
= control target key end

     0   :  { %v552_v1 = vmov 0   ;;  %vm70_vm0 = vcmask 261120   ;;  %v553_v22 = vmov 0.0   ;;  %v35_v27 = vlaneseq  ;;  %s697_s1 = inlined_call_operand.vmem [shape: bf16[32,256], index: 1, kind: input, shape index: {}]   ;;  %s698_s0 = inlined_call_operand.vmem [shape: bf16[16,32], index: 0, kind: input, shape index: {}]   ;;  %s699_s3 = inlined_call_operand.vmem [shape: bf16[256,128], index: 3, kind: input, shape index: {}]   ;;  %s700_s5 = inlined_call_operand.vmem [shape: bf16[128,128], index: 5, kind: input, shape index: {}]   ;;  %s701_s2 = inlined_call_operand.vmem [shape: f32[1,256], index: 2, kind: input, shape index: {}]   ;;  %s702_s4 = inlined_call_operand.vmem [shape: f32[1,128], index: 4, kind: input, shape index: {}]   ;;  %s703_s6 = inlined_call_operand.vmem [shape: f32[1,128], index: 6, kind: input, shape index: {}]   ;;  %s704_s7 = inlined_call_operand.vmem [shape: bf16[16,256], index: 7, kind: output, shape index: {}]  }
   0x1   :  { %v521_v0 = vld [vmem:[%s697_s1 + $0x14] ss:$8 sps:$4 sm:$0xff]   ;;  %106 = vmatprep.mubr.bf16.mxu0 %v552_v1  ;;  %v523_v2 = vld [vmem:[%s697_s1 + $0x10] ss:$8 sps:$4 sm:$0xff]   ;;  %v524_v3 = vld [vmem:[%s697_s1 + $0x4] ss:$8 sps:$4 sm:$0xff]  }
   0x2   :  { %86 = vmatprep.subr.bf16.mxu0 %v521_v0  ;;  %v526_v4 = vld [vmem:[%s697_s1] ss:$8 sps:$4 sm:$0xff]   ;;  %v528_v6 = vld [vmem:[%s699_s3 + $0x78] sm:$0xff]   ;;  %v530_v8 = vld [vmem:[%s699_s3 + $0x70] sm:$0xff]   ;;  %v36_v28 = vshrl.u32 %v35_v27, 7  ;;  %vm554_vm1 = vmmov 0  }
   0x3   :  { %87 = vmatpush1.bf16.msra.mxu0 %v523_v2  ;;  %v527_v5 = vld [vmem:[%s698_s0] sm:$0xff]   ;;  %v529_v7 = vld [vmem:[%s699_s3 + $0x38] sm:$0xff]   ;;  %467 = vmatprep.subr.bf16.mxu1 %v528_v6  ;;  %v531_v9 = vld [vmem:[%s699_s3 + $0x30] sm:$0xff]  }
   0x4   :  { %88 = vmatprep.subr.bf16.mxu0 %v524_v3  ;;  %468 = vmatpush3.bf16.msra.mxu1 %v529_v7  ;;  %v532_v10 = vld [vmem:[%s699_s3 + $0x68] sm:$0xff]   ;;  %v534_v12 = vld [vmem:[%s699_s3 + $0x60] sm:$0xff]   ;;  %v536_v14 = vld [vmem:[%s699_s3 + $0x58] sm:$0xff]   ;;  %v41_v29 = vsub.s32 1, %v36_v28  ;;  %v37_v30 = vsub.s32 0, %v36_v28 }
   0x5   :  { %469 = vmatprep.subr.bf16.mxu1 %v530_v8  ;;  %v533_v11 = vld [vmem:[%s699_s3 + $0x28] sm:$0xff]   ;;  %v535_v13 = vld [vmem:[%s699_s3 + $0x20] sm:$0xff]   ;;  %v537_v15 = vld [vmem:[%s699_s3 + $0x18] sm:$0xff]  }
   0x6   :  { %v538_v16 = vld [vmem:[%s699_s3 + $0x50] sm:$0xff]   ;;  %v540_v18 = vld [vmem:[%s699_s3 + $0x48] sm:$0xff]   ;;  %v542_v20 = vld [vmem:[%s699_s3 + $0x40] sm:$0xff]  }
   0x7   :  { %89 = vmatpush1.bf16.msra.mxu0 %v526_v4  ;;  %v539_v17 = vld [vmem:[%s699_s3 + $0x10] sm:$0xff]   ;;  %v541_v19 = vld [vmem:[%s699_s3 + $0x8] sm:$0xff]   ;;  %v543_v21 = vld [vmem:[%s699_s3] sm:$0xff]  }
   0x8   :  { %470 = vmatpush3.bf16.msra.mxu1 %v531_v9  ;;  %498 = vmatprep.subr.bf16.mxu0 %v553_v22  ;;  %v544_v23 = vld [vmem:[%s700_s5 + $0x38] sm:$0xff]   ;;  %v545_v24 = vld [vmem:[%s700_s5 + $0x30] sm:$0xff]   ;;  %v546_v25 = vld [vmem:[%s700_s5 + $0x28] sm:$0xff]  }
   0x9   :  { %471 = vmatprep.subr.bf16.mxu1 %v532_v10  ;;  %v547_v26 = vld [vmem:[%s700_s5 + $0x20] sm:$0xff]   ;;  %v548_v48 = vld [vmem:[%s700_s5 + $0x18] sm:$0xff]   ;;  %v549_v49 = vld [vmem:[%s700_s5 + $0x10] sm:$0xff]  }
   0xa   :  { %436 = vmatmul.mubr.msk.bf16.vlgmr.msra.gmra.mxu0 %vm70_vm0, %v527_v5  ;;  %v33_v31 = vld [vmem:[%s701_s2] sm:$0x3]  ;;  %v550_v50 = vld [vmem:[%s700_s5 + $0x8] sm:$0xff]  }
   0xb   :  { %499 = vmatpush3.bf16.msra.mxu0 %v544_v23  ;;  %v42_v33 = vrot.slane %v33_v31, %v41_v29  ;;  %v38_v34 = vrot.slane %v33_v31, %v37_v30  ;;  %v551_v51 = vld [vmem:[%s700_s5] sm:$0xff]   ;;  %514 = vmatprep.mubr.msk.bf16.mxu0 %vm554_vm1, %v553_v22 }
   0xc   :  { %472 = vmatpush3.bf16.msra.mxu1 %v533_v11  ;;  %500 = vmatprep.subr.bf16.mxu0 %v553_v22  ;;  %v437_v55 = vld [vmem:[%s702_s4] ss:$0 sm:$0xff] }
   0xd   :  { %473 = vmatprep.subr.bf16.mxu1 %v534_v12  ;;  %v454_v0 = vld [vmem:[%s703_s6] ss:$0 sm:$0xff] }
   0xf   :  { %501 = vmatpush3.bf16.msra.mxu0 %v545_v24 }
  0x10   :  { %474 = vmatpush3.bf16.msra.mxu1 %v535_v13  ;;  %502 = vmatprep.subr.bf16.mxu0 %v553_v22 }
  0x11   :  { %475 = vmatprep.subr.bf16.mxu1 %v536_v14 }
  0x13   :  { %503 = vmatpush3.bf16.msra.mxu0 %v546_v25 }
  0x14   :  { %476 = vmatpush3.bf16.msra.mxu1 %v537_v15  ;;  %504 = vmatprep.subr.bf16.mxu0 %v553_v22 }
  0x15   :  { %477 = vmatprep.subr.bf16.mxu1 %v538_v16 }
  0x17   :  { %505 = vmatpush3.bf16.msra.mxu0 %v547_v26 }
  0x18   :  { %478 = vmatpush3.bf16.msra.mxu1 %v539_v17  ;;  %506 = vmatprep.subr.bf16.mxu0 %v553_v22 }
  0x19   :  { %479 = vmatprep.subr.bf16.mxu1 %v540_v18 }
  0x1b   :  { %507 = vmatpush3.bf16.msra.mxu0 %v548_v48 }
  0x1c   :  { %480 = vmatpush3.bf16.msra.mxu1 %v541_v19  ;;  %508 = vmatprep.subr.bf16.mxu0 %v553_v22 }
  0x1d   :  { %481 = vmatprep.subr.bf16.mxu1 %v542_v20 }
  0x1f   :  { %509 = vmatpush3.bf16.msra.mxu0 %v549_v49 }
  0x20   :  { %482 = vmatpush3.bf16.msra.mxu1 %v543_v21  ;;  %510 = vmatprep.subr.bf16.mxu0 %v553_v22 }
  0x23   :  { %511 = vmatpush3.bf16.msra.mxu0 %v550_v50 }
  0x24   :  { %512 = vmatprep.subr.bf16.mxu0 %v553_v22 }
  0x27   :  { %513 = vmatpush3.bf16.msra.mxu0 %v551_v51 }
  0xca   :  { %v108_v32 = vpop.f32.mrf.mxu0 }
  0xcb   :  { %v109_v39 = vadd.f32 %v108_v32, %v38_v34 }
  0xcc   :  { %v110_v35 = vpop.f32.mrf.mxu0 }
  0xcd   :  { %v111_v37 = vadd.f32 %v110_v35, %v42_v33  ;;  %v117_v45 = vmax.f32 %v109_v39, 0.0 }
  0xce   :  { %v112_v36 = vpop.f32.mrf.mxu0 }
  0xcf   :  { %v113_v38 = vadd.f32 %v112_v36, %v38_v34  ;;  %v118_v43 = vmax.f32 %v111_v37, 0.0 }
  0xd0   :  { %v114_v40 = vpop.f32.mrf.mxu0 }
  0xd1   :  { %v115_v41 = vadd.f32 %v114_v40, %v42_v33  ;;  %v119_v42 = vmax.f32 %v113_v38, 0.0 }
  0xd3   :  { %v120_v44 = vmax.f32 %v115_v41, 0.0  ;;  %v121_v47 = vpack.c.bf16 %v119_v42, %v117_v45 }
  0xd5   :  { %v122_v46 = vpack.c.bf16 %v120_v44, %v118_v43 }
  0xd7   :  { %290 = vmatprep.mubr.bf16.mxu1 %v122_v46 }
  0xd8   :  { %291 = vmatmul.mubr.bf16.vlgmr.msra.gmra.mxu1 %v121_v47 }
 0x198   :  { %v483_v52 = vpop.f32.mrf.mxu1 }
 0x19a   :  { %v484_v53 = vpop.f32.mrf.mxu1 }
 0x19b   :  { %v485_v54 = vadd.f32 %v484_v53, %v483_v52 }
 0x19c   :  { %v486_v56 = vpop.f32.mrf.mxu1 }
 0x19d   :  { %v293_v58 = vadd.f32 %v485_v54, %v437_v55 }
 0x19e   :  { %v487_v57 = vpop.f32.mrf.mxu1 }
 0x19f   :  { %v488_v59 = vadd.f32 %v487_v57, %v486_v56  ;;  %v299_v61 = vmax.f32 %v293_v58, 0.0 }
 0x1a1   :  { %v296_v60 = vadd.f32 %v488_v59, %v437_v55 }
 0x1a3   :  { %v300_v62 = vmax.f32 %v296_v60, 0.0 }
 0x1a5   :  { %v301_v63 = vpack.c.bf16 %v300_v62, %v299_v61 }
 0x1a7   :  { %515 = vmatmul.mubr.bf16.vlgmr.msra.gmra.mxu0 %v301_v63 }
 0x267   :  { %v407_v1 = vpop.f32.mrf.mxu0 }
 0x268   :  { %v408_v2 = vadd.f32 %v454_v0, %v407_v1 }
 0x269   :  { %v516_v3 = vpop.f32.mrf.mxu0 }
 0x26a   :  { %v465_v4 = vpack.c.bf16 %v408_v2, %v299_v61 }
 0x26b   :  { %v410_v5 = vpop.f32.mrf.mxu0 }
 0x26c   :  { %425 = vst [vmem:[%s704_s7] sm:$0xff] %v465_v4  ;;  %v411_v6 = vadd.f32 %v454_v0, %v410_v5 }
 0x26d   :  { %v517_v7 = vpop.f32.mrf.mxu0 }
 0x26e   :  { %v466_v8 = vpack.c.bf16 %v411_v6, %v300_v62 }
 0x270   :  { %426 = vst [vmem:[%s704_s7 + $0x8] sm:$0xff] %v466_v8 }

</bundles_post_ra>
